<compile_context>
chip_gen: v6e
topology: v6e:2x2x1
jax: 0.10.0
libtpu: 0.0.40
codegen_flags: <defaults>
</compile_context>

<pallas_src>
import functools

import jax
import jax.numpy as jnp
from jax.experimental import pallas as pl
from jax.experimental.pallas import tpu as pltpu

LANES = 128
TARGET_TILE_BYTES = 4 * 1024 * 1024      # ~4 MiB per buffer (any dtype)
VMEM_LIMIT_BYTES = 32 * 1024 * 1024      # covers 2 tensors x 2 bufs x 4 MiB + headroom
MIN_KERNEL_ELEMS = 1 << 16               # below this, plain jnp (let XLA fuse)


def _round_up(a, b):
    return -(-a // b) * b


def _horner_f32(xf, w, q):
    # sum_{i=1..q} w[i-1] * x**i  ==  x*(w0 + x*(w1 + ... + x*w_{q-1}))
    acc = xf * w[q - 1]
    for i in range(q - 2, -1, -1):       # static python loop: q is small & static
        acc = (acc + w[i]) * xf
    return acc


def _poly_jnp(x, w32):
    """Plain-jnp path (tiny inputs and <128-element tails)."""
    q = int(w32.shape[0])
    xf = x.astype(jnp.float32)
    w = [w32[i] for i in range(q)]
    return _horner_f32(xf, w, q).astype(x.dtype)


def _poly_kernel(w_ref, x_ref, o_ref, *, q):
    # w_ref: SMEM (q,) f32 coefficients (scalar reads, hoisted once per tile)
    # x_ref/o_ref: VMEM (TILE_R, 128) in the I/O dtype.
    xf = x_ref[...].astype(jnp.float32)
    w = [w_ref[i] for i in range(q)]      # hoist SMEM scalar loads
    acc = _horner_f32(xf, w, q)
    o_ref[...] = acc.astype(o_ref.dtype)


def super_activation(x, w, *, min_kernel_elems=MIN_KERNEL_ELEMS):
    """Apply y = sum_i w[i-1] * x**i elementwise. x: any shape, w: (q,)."""
    q = int(w.shape[0])
    assert q >= 1
    orig_shape = x.shape
    orig_dtype = x.dtype
    w32 = w.astype(jnp.float32)

    flat = x.reshape(-1)
    n = flat.shape[0]

    # Tiny inputs: launch/pipeline overhead dwarfs the work; let XLA fuse.
    if n < max(min_kernel_elems, LANES):
        return _poly_jnp(flat, w32).reshape(orig_shape)

    # Bulk = n rounded down to a multiple of 128 lanes (zero-copy reshape when
    # n is already a multiple).  The <128-element tail is handled with jnp —
    # no whole-array pad/slice passes over HBM.
    rows = n // LANES
    n_main = rows * LANES
    bulk_flat = flat if n_main == n else flat[:n_main]
    x2d = bulk_flat.reshape(rows, LANES)

    # Tile sized in bytes, rounded to the dtype's sublane multiple.
    itemsize = jnp.dtype(orig_dtype).itemsize
    sub = max(8, 32 // itemsize)                       # 8 f32, 16 bf16, 32 int8
    tile_rows = max(sub, (TARGET_TILE_BYTES // (LANES * itemsize)) // sub * sub)

    if rows <= 2 * sub:
        tr = rows                                      # single full-extent block
    else:
        # Force >= 2 grid steps (pipelining + v7x megacore), cap at tile_rows.
        tr = min(tile_rows, _round_up(-(-rows // 2), sub))
    grid = (pl.cdiv(rows, tr),)                        # cdiv + masked OOB tail

    cost = pl.CostEstimate(
        flops=2 * q * rows * LANES,
        transcendentals=0,
        bytes_accessed=2 * rows * LANES * itemsize + q * 4,
    )

    out2d = pl.pallas_call(
        functools.partial(_poly_kernel, q=q),
        out_shape=jax.ShapeDtypeStruct((rows, LANES), orig_dtype),
        grid=grid,
        in_specs=[
            pl.BlockSpec(memory_space=pltpu.SMEM),          # w (scalar reads)
            pl.BlockSpec((tr, LANES), lambda i: (i, 0)),    # x tile
        ],
        out_specs=pl.BlockSpec((tr, LANES), lambda i: (i, 0)),
        compiler_params=pltpu.CompilerParams(
            dimension_semantics=("parallel",),
            vmem_limit_bytes=VMEM_LIMIT_BYTES,
        ),
        cost_estimate=cost,
    )(w32, x2d)

    out = out2d.reshape(-1)
    if n_main != n:
        tail = _poly_jnp(flat[n_main:], w32)
        out = jnp.concatenate([out, tail])
    return out.reshape(orig_shape)


def super_activation_ref(x, w):
    """Pure-JAX reference matching the PyTorch forward (term-sum)."""
    q = int(w.shape[0])
    terms = [w[i - 1] * x ** i for i in range(1, q + 1)]
    return jnp.stack(terms).sum(axis=0)


if __name__ == "__main__":
    key = jax.random.PRNGKey(0)
    kx, kw, kb = jax.random.split(key, 3)

    q = 4
    # Parameter init mirroring nn.Parameter(torch.zeros(q)); w[0]=1, plus a
    # deterministic perturbation so higher powers are exercised.
    w = jnp.zeros((q,), dtype=jnp.float32).at[0].set(1.0)
    w = w + 0.05 * jax.random.normal(kw, (q,), dtype=jnp.float32)

    # 1) Small NCHW conv-map input, forced through the Pallas kernel path.
    x = jax.random.normal(kx, (2, 4, 16, 16), dtype=jnp.float32)
    y = jax.block_until_ready(super_activation(x, w, min_kernel_elems=0))
    y_ref = super_activation_ref(x, w)
    assert y.shape == x.shape and y.dtype == x.dtype
    assert jnp.allclose(y, y_ref, atol=1e-4, rtol=1e-5), (
        float(jnp.max(jnp.abs(y - y_ref))))

    # 1b) Same small input on the default (plain-jnp fusion) path.
    y_small = jax.block_until_ready(super_activation(x, w))
    assert jnp.allclose(y_small, y_ref, atol=1e-4, rtol=1e-5)

    # 2) Medium input: exercises byte-sized tiles + multi-step pipelined grid.
    xb32 = jax.random.normal(kb, (4, 8, 64, 64), dtype=jnp.float32)
    yb32 = jax.block_until_ready(super_activation(xb32, w))
    yb32_ref = super_activation_ref(xb32, w)
    assert jnp.allclose(yb32, yb32_ref, atol=1e-4, rtol=1e-5), (
        float(jnp.max(jnp.abs(yb32 - yb32_ref))))

    # 3) bf16 path (halved HBM traffic; f32 Horner chain, cast on store).
    xbf = xb32.astype(jnp.bfloat16)
    ybf = jax.block_until_ready(super_activation(xbf, w))
    ybf_ref = super_activation_ref(xbf.astype(jnp.float32), w)
    assert ybf.dtype == jnp.bfloat16 and ybf.shape == xbf.shape
    assert jnp.allclose(ybf.astype(jnp.float32), ybf_ref, atol=3e-2, rtol=3e-2)

    # 4) Ragged element count (not a multiple of 128): kernel bulk + jnp tail.
    xr = jax.random.normal(kx, (3, 5, 41), dtype=jnp.float32)
    yr = jax.block_until_ready(super_activation(xr, w, min_kernel_elems=0))
    yr_ref = super_activation_ref(xr, w)
    assert yr.shape == xr.shape
    assert jnp.allclose(yr, yr_ref, atol=1e-4, rtol=1e-5)

    print("KERNEL_OK")
</pallas_src>

<mosaic_0001>
module attributes {stable_mosaic.version = 11 : i64} {
  func.func @_poly_kernel(%arg0: i32, %arg1: memref<4xf32, #tpu.memory_space<smem>>, %arg2: memref<16x128xf32, #tpu.memory_space<vmem>>, %arg3: memref<16x128xf32, #tpu.memory_space<vmem>>) attributes {dimension_semantics = [#tpu.dimension_semantics<parallel>], iteration_bounds = array<i64: 1>, scalar_prefetch = 0 : i64, scratch_operands = 0 : i64, tpu.core_type = #tpu.core_type<tc>, window_params = [{transform_indices = @transform_0, window_bounds = array<i64: 4>}, {transform_indices = @transform_1, window_bounds = array<i64: 16, 128>}, {transform_indices = @transform_2, window_bounds = array<i64: 16, 128>}]} {
    %c0 = arith.constant 0 : index
    %c0_0 = arith.constant 0 : index
    %0 = vector.load %arg2[%c0, %c0_0] : memref<16x128xf32, #tpu.memory_space<vmem>>, vector<16x128xf32>
    %c0_1 = arith.constant 0 : index
    %1 = memref.load %arg1[%c0_1] : memref<4xf32, #tpu.memory_space<smem>>
    %c1 = arith.constant 1 : index
    %2 = memref.load %arg1[%c1] : memref<4xf32, #tpu.memory_space<smem>>
    %c2 = arith.constant 2 : index
    %3 = memref.load %arg1[%c2] : memref<4xf32, #tpu.memory_space<smem>>
    %c3 = arith.constant 3 : index
    %4 = memref.load %arg1[%c3] : memref<4xf32, #tpu.memory_space<smem>>
    %5 = vector.broadcast %4 : f32 to vector<16x128xf32>
    %6 = arith.mulf %0, %5 : vector<16x128xf32>
    %7 = vector.broadcast %3 : f32 to vector<16x128xf32>
    %8 = arith.addf %6, %7 : vector<16x128xf32>
    %9 = arith.mulf %8, %0 : vector<16x128xf32>
    %10 = vector.broadcast %2 : f32 to vector<16x128xf32>
    %11 = arith.addf %9, %10 : vector<16x128xf32>
    %12 = arith.mulf %11, %0 : vector<16x128xf32>
    %13 = vector.broadcast %1 : f32 to vector<16x128xf32>
    %14 = arith.addf %12, %13 : vector<16x128xf32>
    %15 = arith.mulf %14, %0 : vector<16x128xf32>
    %c0_2 = arith.constant 0 : index
    %c0_3 = arith.constant 0 : index
    %16 = vector.load %arg3[%c0_2, %c0_3] : memref<16x128xf32, #tpu.memory_space<vmem>>, vector<16x128xf32>
    tpu.vector_store %arg3[%c0_2, %c0_3], %15 {strides = array<i32>} : memref<16x128xf32, #tpu.memory_space<vmem>>, vector<16x128xf32>,
    return
  }
  func.func @transform_0(%arg0: i32) -> i32 {
    %c0_i32 = arith.constant 0 : i32
    %c0_i32_0 = arith.constant 0 : i32
    return %c0_i32 : i32
  }
  func.func @transform_1(%arg0: i32) -> (i32, i32) {
    %c0_i32 = arith.constant 0 : i32
    %c0_i32_0 = arith.constant 0 : i32
    return %arg0, %c0_i32 : i32, i32
  }
  func.func @transform_2(%arg0: i32) -> (i32, i32) {
    %c0_i32 = arith.constant 0 : i32
    %c0_i32_0 = arith.constant 0 : i32
    return %arg0, %c0_i32 : i32, i32
  }
}

</mosaic_0001>

<bundles_post_ra>
// kernel: tpu_custom_call.1
= control target key start
LH: loop header
LB: loop body
LE: loop exit
PB: predicated region body
PF: predicated region fallthrough
CT: control target
= control target key end

     0   :  { %7 = vsyncpa [#allocation5], 0  ;;  %s178_s0 = inlined_call_operand.hbm [shape: f32[4], index: 0, kind: input, shape index: {}]   ;;  %s179_s1 = inlined_call_operand.hbm [shape: f32[16,128], index: 1, kind: input, shape index: {}]   ;;  %s180_s2 = inlined_call_operand.hbm [shape: f32[16,128], index: 2, kind: output, shape index: {}]  }
   0x1   :  { %8 = vsyncpa [#allocation3], 0 }
   0x2   :  { %9 = vsyncpa [#allocation4], 0  ;;  %s143_s9 = smov [#allocation2]   ;;  %s144_s12 = smov [#allocation6]  }
   0x3   :  { %17 = dma.hbm_to_smem %s178_s0, 16, %s143_s9, [#allocation5]  }
   0x4   :  { %s23_s13 = sshll.u32 %s144_s12, 4  ;;  %s24_s13 = int_to_ptr.vmem [resolvable:$true] %s23_s13 }
   0x5   :  { %s105_s14 = scalar_lea.vmem %s24_s13, 256  ;;  %p110_p1 = scmp.lt.s32.totalorder %s24_s13, %s24_s13 }
   0x6   :  { %p106_p0 = scmp.ne.s32.totalorder %s24_s13, %s105_s14  ;;  %p111_p2 = scmp.lt.s32.totalorder %s105_s14, %s105_s14 }
   0x8   :  { %p112_p3 = por %p111_p2, %p110_p1 }
   0xa   :  { %p113_p4 = pnand %p112_p3, %p106_p0 }
   0xc   :  { %116 = shalt.err (!%p113_p4)
}
   0xd   :  { %s145_s15 = smov 128   ;;  %s146_s16 = smov 8  }
   0xe   :  { %29 = dma.hbm_to_vmem [thread:$0]  %s179_s1, 256, %s24_s13, [#allocation3], %s145_s15, %s145_s15, %s146_s16  }
   0xf   :  { %137 = dma.done.wait [#allocation5], 16  }
  0x10   :  { %138 = vsyncadd [#allocation5], 4294967280 }
  0x11   :  { %139 = dma.done.wait [#allocation3], 256  }
  0x12   :  { %140 = vsyncadd [#allocation3], 4294967040 }
  0x13   :  { %36 = sfence }
  0x14   :  { %s82_s0 = sld [smem:[#allocation2 + $0x2]]  ;;  %v37_v0 = vld [vmem:[#allocation6] sm:$0xff]  ;;  %v38_v1 = vld [vmem:[#allocation6 + $0x8] sm:$0xff]  ;;  %s147_s1 = smov [#allocation7]  }
  0x15   :  { %s83_s19 = sld [smem:[#allocation2 + $0x3]]  ;;  %s68_s22 = sshll.u32 %s147_s1, 4  ;;  %s69_s22 = int_to_ptr.vmem [resolvable:$true] %s68_s22 }
  0x16   :  { %s81_s20 = sld [smem:[#allocation2 + $0x1]]  ;;  %s117_s23 = scalar_lea.vmem %s69_s22, 256 }
  0x17   :  { %s39_s21 = sld [smem:[#allocation2]]  ;;  %p118_p5 = scmp.ne.s32.totalorder %s69_s22, %s117_s23 }
  0x18   :  { %p122_p6 = scmp.lt.s32.totalorder %s69_s22, %s69_s22  ;;  %p123_p7 = scmp.lt.s32.totalorder %s117_s23, %s117_s23 }
  0x1a   :  { %v46_v3 = vstv %s82_s0  ;;  %p124_p8 = por %p123_p7, %p122_p6 }
  0x1b   :  { %v43_v2 = vstv %s83_s19 }
  0x1c   :  { %v44_v4 = vmul.f32 %v43_v2, %v37_v0  ;;  %v45_v5 = vmul.f32 %v43_v2, %v38_v1  ;;  %v51_v8 = vstv %s81_s20  ;;  %p125_p9 = pnand %p124_p8, %p118_p5 }
  0x1d   :  { %v56_v13 = vstv %s39_s21 }
  0x1e   :  { %v47_v6 = vadd.f32 %v46_v3, %v44_v4  ;;  %v48_v7 = vadd.f32 %v46_v3, %v45_v5 }
  0x20   :  { %v49_v9 = vmul.f32 %v47_v6, %v37_v0  ;;  %v50_v10 = vmul.f32 %v48_v7, %v38_v1 }
  0x22   :  { %v52_v11 = vadd.f32 %v51_v8, %v49_v9  ;;  %v53_v12 = vadd.f32 %v51_v8, %v50_v10 }
  0x24   :  { %v54_v14 = vmul.f32 %v52_v11, %v37_v0  ;;  %v55_v15 = vmul.f32 %v53_v12, %v38_v1 }
  0x26   :  { %v57_v16 = vadd.f32 %v56_v13, %v54_v14  ;;  %v58_v17 = vadd.f32 %v56_v13, %v55_v15 }
  0x28   :  { %v59_v18 = vmul.f32 %v57_v16, %v37_v0  ;;  %v60_v19 = vmul.f32 %v58_v17, %v38_v1 }
  0x2a   :  { %61 = vst [vmem:[#allocation7] sm:$0xff] %v59_v18  ;;  %62 = vst [vmem:[#allocation7 + $0x8] sm:$0xff] %v60_v19 }
  0x2b   :  { %128 = shalt.err (!%p125_p9)
}
  0x2c   :  { %74 = dma.vmem_to_hbm [thread:$0]  %s69_s22, 256, %s180_s2, [#allocation4], %s145_s15, %s145_s15, %s146_s16  }
  0x2d   :  { %141 = dma.done.wait [#allocation4], 256  }
  0x2e   :  { %142 = vsyncadd [#allocation4], 4294967040 }
  0x2f   :  { %78 = vsyncpa [#allocation3], 1 }
  0x30   :  { %79 = vsyncpa [#allocation4], 1 }
  0x31   :  { %80 = vsyncpa [#allocation5], 1 }

</bundles_post_ra>
